<compile_context>
chip_gen: v7x
topology: tpu7x:2x2x1
jax: 0.10.0
libtpu: 0.0.40
codegen_flags: <defaults>
</compile_context>

<pallas_src>
import functools

import jax
import jax.numpy as jnp
from jax import lax
from jax.experimental import pallas as pl
from jax.experimental.pallas import tpu as pltpu

_LANE = 128


# --------------------------------------------------------------------------- helpers
def _ceil_to(v, m):
    return (v + m - 1) // m * m


def _vmem_budget():
    """~85% of physical per-core VMEM (generation aware); conservative fallback."""
    try:
        cap = int(pltpu.get_tpu_info().vmem_capacity_bytes)
    except Exception:
        cap = 64 << 20          # safe on v5e/v6e/v7x if the query is unavailable
    return int(cap * 0.85)


def _params(semantics, vmem_budget):
    return pltpu.CompilerParams(dimension_semantics=semantics,
                                vmem_limit_bytes=int(vmem_budget))


def _h_tile(H, p, W, Cpi, act_bytes, budget):
    """Largest divisor of H whose pass-A working set fits a fraction of VMEM."""
    Wp = W + 2 * p
    cap = min(budget // 3, 24 << 20)

    def need(th):
        thp = th + 2 * p
        return (2 * thp * Wp * Cpi * 4            # double-buffered input slab (f32)
                + 2 * th * W * Cpi * act_bytes    # double-buffered y output block
                + 2 * th * W * Cpi * 4)           # in-flight f32 accumulator / term

    best = 1
    for th in range(1, H + 1):
        if H % th == 0 and need(th) <= cap:
            best = th
    return best


def _row_tile(M, Cpi, Cpo, act_bytes, budget, target=None):
    """Row tile for passes B/C: largest multiple-of-8 divisor of M within the VMEM budget.
    # TODO(synk): masked cdiv grid instead of the full-extent fallback for pathological M."""
    if target is None:
        w_bytes = 2 * Cpi * Cpo * act_bytes                    # double-buffered weight block
        row_bytes = 2 * (Cpi + Cpo) * act_bytes + 2 * Cpo * 4
        avail = max(budget // 2 - w_bytes, 8 * row_bytes)
        gen_target = 2048 if budget > (80 << 20) else 1024 if budget > (48 << 20) else 512
        target = max(8, min(gen_target, avail // row_bytes))
    t = min(int(target), M)
    for mt in range(t - t % 8, 7, -8):
        if M % mt == 0:
            return mt
    return M


# --------------------------------------------------------------------------- kernels
def _dw_kernel(xp_hbm, wdw_ref, bdw_ref, y_ref, s1_ref, q1_ref, xbuf, sem,
               *, k, p, th, W):
    """Depthwise kxk conv on one halo'd (th+2p)-row slab (residual folded into the centre
    tap) + bias + ReLU.  Manual double-buffered DMA of the slab; per-sample BN1 partials."""
    n = pl.program_id(0)
    h = pl.program_id(1)
    HT = pl.num_programs(1)
    thp = th + 2 * p
    slot = h & 1

    def fetch(hh, sl):
        pltpu.make_async_copy(xp_hbm.at[n, pl.ds(hh * th, thp)],
                              xbuf.at[sl], sem.at[sl]).start()

    @pl.when(h == 0)                      # prime this sample's first slab + zero partials
    def _():
        fetch(0, 0)
        s1_ref[...] = jnp.zeros_like(s1_ref)
        q1_ref[...] = jnp.zeros_like(q1_ref)

    @pl.when(h + 1 < HT)                  # prefetch next slab (same sample only, so the
    def _():                              # "parallel" N axis is safe under core sharding)
        fetch(h + 1, 1 - slot)

    pltpu.make_async_copy(xp_hbm.at[n, pl.ds(h * th, thp)],
                          xbuf.at[slot], sem.at[slot]).wait()

    xslab = xbuf.at[slot]                 # (thp, Wp, Cpi) ref view, no load
    acc = None
    for kx in range(k):                   # one W(sublane)-shifted slab read per kx;
        xs = xslab[:, kx:kx + W, :]       # the ky shifts below are outer-dim selects
        for ky in range(k):
            tap = wdw_ref[ky * k + kx, :]
            term = xs[ky:ky + th] * tap
            acc = term if acc is None else acc + term

    y = jnp.maximum(acc + bdw_ref[0, :], 0.0)          # bias + ReLU, f32
    y_ref[0] = y.astype(y_ref.dtype)                   # bf16 (or f32) activation store

    ysum = jnp.sum(jnp.sum(y, axis=0), axis=0)         # (Cpi,)  f32 BN1 stats
    qsum = jnp.sum(jnp.sum(y * y, axis=0), axis=0)
    s1_ref[...] += ysum[None, None, :]
    q1_ref[...] += qsum[None, None, :]


def _pw_kernel(y_ref, w_ref, b_ref, z_ref, s2_ref, q2_ref):
    """1x1 conv on the MXU (BN1 pre-folded into w/b) + ReLU + per-core BN2 partial stats."""
    i = pl.program_id(1)

    @pl.when(i == 0)
    def _():
        s2_ref[...] = jnp.zeros_like(s2_ref)
        q2_ref[...] = jnp.zeros_like(q2_ref)

    z = jnp.dot(y_ref[...], w_ref[...], preferred_element_type=jnp.float32)
    z = jnp.maximum(z + b_ref[...], 0.0)
    z_ref[...] = z.astype(z_ref.dtype)

    s2_ref[...] += jnp.sum(z, axis=0)[None, None, :]
    q2_ref[...] += jnp.sum(z * z, axis=0)[None, None, :]


def _bn2_kernel(z_ref, a_ref, c_ref, o_ref):
    o_ref[...] = (z_ref[...].astype(jnp.float32) * a_ref[...] + c_ref[...]).astype(o_ref.dtype)


# --------------------------------------------------------------------------- wrapper
def convmixer_block(x_nchw, params, kernel_size, eps=1e-5,
                    compute_dtype=jnp.bfloat16, h_tile=None, row_target=None):
    """Pallas forward pass of ConvMixerBlock (training-mode BatchNorm).

    x_nchw: (N, C_in, H, W) float32 -> (N, C_out, H, W) float32.
    `compute_dtype` controls the stored inter-pass activations and the MXU input dtype of
    the 1x1 conv (bf16 default); BN statistics always accumulate in f32.
    """
    N, C_in, H, W = x_nchw.shape
    k = kernel_size
    assert k % 2 == 1, "ConvMixerBlock requires an odd kernel size (same padding + residual)"
    p = k // 2
    C_out = params["pw_weight"].shape[0]

    f32 = jnp.float32
    act = jnp.dtype(compute_dtype)
    ab = act.itemsize
    Cpi = _ceil_to(C_in, _LANE)
    Cpo = _ceil_to(C_out, _LANE)
    Wp = W + 2 * p
    M = N * H * W
    budget = _vmem_budget()

    # NHWC + spatial halo + lane padding in one fused XLA pad; padded channels stay exactly
    # zero through every stage and are sliced off at the end.
    # TODO(synk): fuse this relayout (and the final NHWC->NCHW transpose) into the kernels
    # with border masking / a transposing out_spec to save two extra HBM passes.
    x = jnp.transpose(x_nchw, (0, 2, 3, 1)).astype(f32)
    xp = jnp.pad(x, ((0, 0), (p, p), (p, p), (0, Cpi - C_in)))

    # depthwise taps (C,1,k,k) -> (k*k, Cpi); fold `scale * x0` into the centre tap.
    wdw = jnp.pad(params["dw_weight"].astype(f32).reshape(C_in, k * k).T,
                  ((0, 0), (0, Cpi - C_in)))
    wdw = wdw.at[p * k + p, :C_in].add(params["scale"].astype(f32)[0])
    bdw = jnp.pad(params["dw_bias"].astype(f32), (0, Cpi - C_in))[None, :]

    # ---- pass A: H-tiled depthwise + residual + ReLU + per-sample BN1 stats -------------
    th = h_tile if h_tile is not None else _h_tile(H, p, W, Cpi, ab, budget)
    assert H % th == 0, "h_tile must divide H"
    HT = H // th
    thp = th + 2 * p

    y, s1, q1 = pl.pallas_call(
        functools.partial(_dw_kernel, k=k, p=p, th=th, W=W),
        grid=(N, HT),
        in_specs=[
            pl.BlockSpec(memory_space=pl.ANY),                    # padded x stays in HBM
            pl.BlockSpec((k * k, Cpi), lambda n, h: (0, 0)),
            pl.BlockSpec((1, Cpi), lambda n, h: (0, 0)),
        ],
        out_specs=[
            pl.BlockSpec((1, th, W, Cpi), lambda n, h: (n, h, 0, 0)),
            pl.BlockSpec((1, 1, Cpi), lambda n, h: (n, 0, 0)),    # per-sample partials ->
            pl.BlockSpec((1, 1, Cpi), lambda n, h: (n, 0, 0)),    # N axis can be "parallel"
        ],
        out_shape=[
            jax.ShapeDtypeStruct((N, H, W, Cpi), act),
            jax.ShapeDtypeStruct((N, 1, Cpi), f32),
            jax.ShapeDtypeStruct((N, 1, Cpi), f32),
        ],
        scratch_shapes=[
            pltpu.VMEM((2, thp, Wp, Cpi), f32),                   # double-buffered input slab
            pltpu.SemaphoreType.DMA((2,)),
        ],
        compiler_params=_params(("parallel", "arbitrary"), budget),
    )(xp, wdw, bdw)

    # ---- fold BN1 (global batch stats, biased variance) into the 1x1-conv weights -------
    # TODO(synk): E[x^2]-E[x]^2 in f32 can cancel for very large M; switch to centered
    # per-tile partials if tighter accuracy is ever required.
    cnt = jnp.float32(M)
    mu1 = s1.sum(axis=0) / cnt                          # (1, Cpi)
    var1 = jnp.maximum(q1.sum(axis=0) / cnt - mu1 * mu1, 0.0)
    g1 = jnp.pad(params["bn1_weight"].astype(f32), (0, Cpi - C_in))[None, :]
    b1 = jnp.pad(params["bn1_bias"].astype(f32), (0, Cpi - C_in))[None, :]
    a1 = g1 * lax.rsqrt(var1 + eps)
    c1 = b1 - mu1 * a1

    wpw = jnp.pad(params["pw_weight"].astype(f32).reshape(C_out, C_in).T,
                  ((0, Cpi - C_in), (0, Cpo - C_out)))              # (Cpi, Cpo)
    bpw = jnp.pad(params["pw_bias"].astype(f32), (0, Cpo - C_out))[None, :]
    w_eff = (a1.T * wpw).astype(compute_dtype)          # BN1 scale folded into weights
    b_eff = jnp.dot(c1, wpw) + bpw                      # BN1 shift folded into bias (f32)

    # ---- pass B: 1x1 conv (MXU) + ReLU + per-core BN2 stats ------------------------------
    y2d = y.reshape(M, Cpi)                             # free metadata reshape
    mt = _row_tile(M, Cpi, Cpo, ab, budget, target=row_target)
    assert M % mt == 0 and (mt % 8 == 0 or mt == M)
    nblk = M // mt
    ncs = 2 if nblk % 2 == 0 else 1                     # 2-way row split -> both TCs on v7x
    nbc = nblk // ncs

    z2d, s2, q2 = pl.pallas_call(
        _pw_kernel,
        grid=(ncs, nbc),
        in_specs=[
            pl.BlockSpec((mt, Cpi), lambda c, i: (c * nbc + i, 0)),
            pl.BlockSpec((Cpi, Cpo), lambda c, i: (0, 0)),
            pl.BlockSpec((1, Cpo), lambda c, i: (0, 0)),
        ],
        out_specs=[
            pl.BlockSpec((mt, Cpo), lambda c, i: (c * nbc + i, 0)),
            pl.BlockSpec((1, 1, Cpo), lambda c, i: (c, 0, 0)),     # per-core partial stats
            pl.BlockSpec((1, 1, Cpo), lambda c, i: (c, 0, 0)),
        ],
        out_shape=[
            jax.ShapeDtypeStruct((M, Cpo), act),
            jax.ShapeDtypeStruct((ncs, 1, Cpo), f32),
            jax.ShapeDtypeStruct((ncs, 1, Cpo), f32),
        ],
        compiler_params=_params(("parallel", "arbitrary"), budget),
    )(y2d, w_eff, b_eff)

    # ---- fold BN2 and apply it in a parallel elementwise pass ----------------------------
    mu2 = s2.sum(axis=0) / cnt                          # (1, Cpo)
    var2 = jnp.maximum(q2.sum(axis=0) / cnt - mu2 * mu2, 0.0)
    g2 = jnp.pad(params["bn2_weight"].astype(f32), (0, Cpo - C_out))[None, :]
    b2 = jnp.pad(params["bn2_bias"].astype(f32), (0, Cpo - C_out))[None, :]
    a2 = g2 * lax.rsqrt(var2 + eps)
    c2 = b2 - mu2 * a2

    o2d = pl.pallas_call(
        _bn2_kernel,
        grid=(nblk,),
        in_specs=[
            pl.BlockSpec((mt, Cpo), lambda i: (i, 0)),
            pl.BlockSpec((1, Cpo), lambda i: (0, 0)),
            pl.BlockSpec((1, Cpo), lambda i: (0, 0)),
        ],
        out_specs=pl.BlockSpec((mt, Cpo), lambda i: (i, 0)),
        out_shape=jax.ShapeDtypeStruct((M, Cpo), f32),
        compiler_params=_params(("parallel",), budget),
    )(z2d, a2, c2)

    out = o2d.reshape(N, H, W, Cpo)[..., :C_out]
    return jnp.transpose(out, (0, 3, 1, 2))


# --------------------------------------------------------------------------- reference
def reference_forward(x_nchw, params, kernel_size, eps=1e-5):
    """Pure-JAX reference mirroring the PyTorch module (training-mode BN)."""
    N, C_in, H, W = x_nchw.shape
    k = kernel_size
    C_out = params["pw_weight"].shape[0]
    x0 = x_nchw

    dw = lax.conv_general_dilated(
        x_nchw, params["dw_weight"], window_strides=(1, 1),
        padding=[(k // 2, k // 2), (k // 2, k // 2)],
        feature_group_count=C_in,
        dimension_numbers=("NCHW", "OIHW", "NCHW"),
    ) + params["dw_bias"][None, :, None, None]

    y = jnp.maximum(dw + params["scale"] * x0, 0.0)
    mu1 = y.mean(axis=(0, 2, 3), keepdims=True)
    var1 = y.var(axis=(0, 2, 3), keepdims=True)
    y = ((y - mu1) / jnp.sqrt(var1 + eps)
         * params["bn1_weight"][None, :, None, None]
         + params["bn1_bias"][None, :, None, None])

    z = jnp.einsum("nchw,oc->nohw", y, params["pw_weight"].reshape(C_out, C_in)) \
        + params["pw_bias"][None, :, None, None]
    z = jnp.maximum(z, 0.0)
    mu2 = z.mean(axis=(0, 2, 3), keepdims=True)
    var2 = z.var(axis=(0, 2, 3), keepdims=True)
    z = ((z - mu2) / jnp.sqrt(var2 + eps)
         * params["bn2_weight"][None, :, None, None]
         + params["bn2_bias"][None, :, None, None])
    return z


def init_params(key, filters_in, filters_out, kernel_size):
    k1, k2, k3, k4 = jax.random.split(key, 4)
    return {
        "dw_weight": 0.1 * jax.random.normal(
            k1, (filters_in, 1, kernel_size, kernel_size), jnp.float32),
        "dw_bias": 0.1 * jax.random.normal(k2, (filters_in,), jnp.float32),
        "pw_weight": 0.1 * jax.random.normal(
            k3, (filters_out, filters_in, 1, 1), jnp.float32),
        "pw_bias": 0.1 * jax.random.normal(k4, (filters_out,), jnp.float32),
        "scale": jnp.ones((1,), jnp.float32),
        "bn1_weight": jnp.ones((filters_in,), jnp.float32),
        "bn1_bias": jnp.zeros((filters_in,), jnp.float32),
        "bn2_weight": jnp.ones((filters_out,), jnp.float32),
        "bn2_bias": jnp.zeros((filters_out,), jnp.float32),
    }


if __name__ == "__main__":
    key = jax.random.PRNGKey(0)
    key_x, key_p = jax.random.split(key)

    N, C_in, C_out, H, W, KSIZE = 2, 4, 8, 16, 16, 3
    x = jax.random.normal(key_x, (N, C_in, H, W), jnp.float32)
    params = init_params(key_p, C_in, C_out, KSIZE)

    ref = reference_forward(x, params, KSIZE)

    # f32 path with forced small tiles: exercises the H-tiled double-buffered DMA
    # (pass A grid (2, 4)) and the 2-way "parallel" row split of pass B (grid (2, 2)).
    out_f32 = jax.block_until_ready(
        convmixer_block(x, params, KSIZE, compute_dtype=jnp.float32,
                        h_tile=4, row_target=128))
    assert out_f32.shape == (N, C_out, H, W)
    assert jnp.allclose(out_f32, ref, atol=1e-3, rtol=1e-3), \
        f"f32 max abs diff {jnp.max(jnp.abs(out_f32 - ref))}"

    # default path: bf16 inter-pass activations + bf16 MXU inputs (f32 accumulation),
    # tile sizes / VMEM limit auto-derived from the TPU generation.
    out = jax.block_until_ready(convmixer_block(x, params, KSIZE))
    assert out.shape == (N, C_out, H, W)
    assert jnp.allclose(out, ref, atol=5e-2, rtol=5e-2), \
        f"bf16 max abs diff {jnp.max(jnp.abs(out - ref))}"

    print("KERNEL_OK")
</pallas_src>

<mosaic_0001>
module attributes {stable_mosaic.version = 11 : i64} {
  func.func @_dw_kernel(%arg0: i32, %arg1: i32, %arg2: memref<2x18x18x128xf32, #tpu.memory_space<any>>, %arg3: memref<9x128xf32, #tpu.memory_space<vmem>>, %arg4: memref<1x128xf32, #tpu.memory_space<vmem>>, %arg5: memref<1x4x16x128xf32, #tpu.memory_space<vmem>>, %arg6: memref<1x1x128xf32, #tpu.memory_space<vmem>>, %arg7: memref<1x1x128xf32, #tpu.memory_space<vmem>>, %arg8: memref<2x6x18x128xf32, #tpu.memory_space<vmem>>, %arg9: memref<2x!tpu.dma_semaphore, #tpu.memory_space<semaphore_mem>>) attributes {dimension_semantics = [#tpu.dimension_semantics<parallel>, #tpu.dimension_semantics<arbitrary>], iteration_bounds = array<i64: 2, 4>, scalar_prefetch = 0 : i64, scratch_operands = 2 : i64, tpu.core_type = #tpu.core_type<tc>, window_params = [{}, {pipeline_mode = #tpu.pipeline_mode<synchronous>, transform_indices = @transform_1, window_bounds = array<i64: 9, 128>}, {pipeline_mode = #tpu.pipeline_mode<synchronous>, transform_indices = @transform_2, window_bounds = array<i64: 1, 128>}, {transform_indices = @transform_3, window_bounds = array<i64: 1, 4, 16, 128>}, {transform_indices = @transform_4, window_bounds = array<i64: 1, 1, 128>}, {transform_indices = @transform_5, window_bounds = array<i64: 1, 1, 128>}]} {
    %c1_i32 = arith.constant 1 : i32
    %0 = arith.andi %arg1, %c1_i32 : i32
    %c0_i32 = arith.constant 0 : i32
    %1 = arith.cmpi eq, %arg1, %c0_i32 : i32
    %2 = arith.extui %1 : i1 to i32
    %c0_i32_0 = arith.constant 0 : i32
    %3 = arith.cmpi ne, %2, %c0_i32_0 : i32
    scf.if %3 {
      %c0_i32_58 = arith.constant 0 : i32
      %c0_i32_59 = arith.constant 0 : i32
      %c0_i32_60 = arith.constant 0 : i32
      %c0_i32_61 = arith.constant 0 : i32
      %c0_i32_62 = arith.constant 0 : i32
      %109 = tpu.memref_slice %arg2[%arg0, %c0_i32_60, %c0_i32_61, %c0_i32_62] : memref<2x18x18x128xf32, #tpu.memory_space<any>> -> memref<1x6x18x128xf32, #tpu.memory_space<any>>
      %110 = tpu.memref_squeeze %109 : memref<1x6x18x128xf32, #tpu.memory_space<any>> -> memref<6x18x128xf32, #tpu.memory_space<any>>
      %c0_i32_63 = arith.constant 0 : i32
      %c0_i32_64 = arith.constant 0 : i32
      %c0_i32_65 = arith.constant 0 : i32
      %111 = tpu.memref_slice %arg8[%c0_i32_58, %c0_i32_63, %c0_i32_64, %c0_i32_65] : memref<2x6x18x128xf32, #tpu.memory_space<vmem>> -> memref<1x6x18x128xf32, #tpu.memory_space<vmem>>
      %112 = tpu.memref_squeeze %111 : memref<1x6x18x128xf32, #tpu.memory_space<vmem>> -> memref<6x18x128xf32, #tpu.memory_space<vmem>>
      %113 = tpu.memref_slice %arg9[%c0_i32_59] : memref<2x!tpu.dma_semaphore, #tpu.memory_space<semaphore_mem>> -> memref<1x!tpu.dma_semaphore, #tpu.memory_space<semaphore_mem>>
      %114 = tpu.memref_squeeze %113 : memref<1x!tpu.dma_semaphore, #tpu.memory_space<semaphore_mem>> -> memref<!tpu.dma_semaphore, #tpu.memory_space<semaphore_mem>>
      tpu.enqueue_dma source(%110 : memref<6x18x128xf32, #tpu.memory_space<any>>) target(%112 : memref<6x18x128xf32, #tpu.memory_space<vmem>>) target_semaphore(%114 : memref<!tpu.dma_semaphore, #tpu.memory_space<semaphore_mem>>)
      %cst_66 = arith.constant 0.000000e+00 : f32
      %115 = vector.broadcast %cst_66 : f32 to vector<1x1x128xf32>
      %c0_67 = arith.constant 0 : index
      %c0_68 = arith.constant 0 : index
      %c0_69 = arith.constant 0 : index
      %116 = vector.load %arg6[%c0_67, %c0_68, %c0_69] : memref<1x1x128xf32, #tpu.memory_space<vmem>>, vector<1x1x128xf32>
      tpu.vector_store %arg6[%c0_67, %c0_68, %c0_69], %115 {strides = array<i32>} : memref<1x1x128xf32, #tpu.memory_space<vmem>>, vector<1x1x128xf32>,
      %cst_70 = arith.constant 0.000000e+00 : f32
      %117 = vector.broadcast %cst_70 : f32 to vector<1x1x128xf32>
      %c0_71 = arith.constant 0 : index
      %c0_72 = arith.constant 0 : index
      %c0_73 = arith.constant 0 : index
      %118 = vector.load %arg7[%c0_71, %c0_72, %c0_73] : memref<1x1x128xf32, #tpu.memory_space<vmem>>, vector<1x1x128xf32>
      tpu.vector_store %arg7[%c0_71, %c0_72, %c0_73], %117 {strides = array<i32>} : memref<1x1x128xf32, #tpu.memory_space<vmem>>, vector<1x1x128xf32>,
    } else {
    }
    %c1_i32_1 = arith.constant 1 : i32
    %4 = arith.addi %arg1, %c1_i32_1 : i32
    %c4_i32 = arith.constant 4 : i32
    %5 = arith.cmpi slt, %4, %c4_i32 : i32
    %6 = arith.extui %5 : i1 to i32
    %c0_i32_2 = arith.constant 0 : i32
    %7 = arith.cmpi ne, %6, %c0_i32_2 : i32
    scf.if %7 {
      %c1_i32_58 = arith.constant 1 : i32
      %109 = arith.addi %arg1, %c1_i32_58 : i32
      %c1_i32_59 = arith.constant 1 : i32
      %110 = arith.subi %c1_i32_59, %0 : i32
      %c4_i32_60 = arith.constant 4 : i32
      %111 = arith.muli %109, %c4_i32_60 : i32
      %c0_i32_61 = arith.constant 0 : i32
      %c0_i32_62 = arith.constant 0 : i32
      %112 = tpu.memref_slice %arg2[%arg0, %111, %c0_i32_61, %c0_i32_62] : memref<2x18x18x128xf32, #tpu.memory_space<any>> -> memref<1x6x18x128xf32, #tpu.memory_space<any>>
      %113 = tpu.memref_squeeze %112 : memref<1x6x18x128xf32, #tpu.memory_space<any>> -> memref<6x18x128xf32, #tpu.memory_space<any>>
      %c0_i32_63 = arith.constant 0 : i32
      %c0_i32_64 = arith.constant 0 : i32
      %c0_i32_65 = arith.constant 0 : i32
      %114 = tpu.memref_slice %arg8[%110, %c0_i32_63, %c0_i32_64, %c0_i32_65] : memref<2x6x18x128xf32, #tpu.memory_space<vmem>> -> memref<1x6x18x128xf32, #tpu.memory_space<vmem>>
      %115 = tpu.memref_squeeze %114 : memref<1x6x18x128xf32, #tpu.memory_space<vmem>> -> memref<6x18x128xf32, #tpu.memory_space<vmem>>
      %116 = tpu.memref_slice %arg9[%110] : memref<2x!tpu.dma_semaphore, #tpu.memory_space<semaphore_mem>> -> memref<1x!tpu.dma_semaphore, #tpu.memory_space<semaphore_mem>>
      %117 = tpu.memref_squeeze %116 : memref<1x!tpu.dma_semaphore, #tpu.memory_space<semaphore_mem>> -> memref<!tpu.dma_semaphore, #tpu.memory_space<semaphore_mem>>
      tpu.enqueue_dma source(%113 : memref<6x18x128xf32, #tpu.memory_space<any>>) target(%115 : memref<6x18x128xf32, #tpu.memory_space<vmem>>) target_semaphore(%117 : memref<!tpu.dma_semaphore, #tpu.memory_space<semaphore_mem>>)
    } else {
    }
    %c4_i32_3 = arith.constant 4 : i32
    %8 = arith.muli %arg1, %c4_i32_3 : i32
    %c0_i32_4 = arith.constant 0 : i32
    %c0_i32_5 = arith.constant 0 : i32
    %9 = tpu.memref_slice %arg2[%arg0, %8, %c0_i32_4, %c0_i32_5] : memref<2x18x18x128xf32, #tpu.memory_space<any>> -> memref<1x6x18x128xf32, #tpu.memory_space<any>>
    %10 = tpu.memref_squeeze %9 : memref<1x6x18x128xf32, #tpu.memory_space<any>> -> memref<6x18x128xf32, #tpu.memory_space<any>>
    %c0_i32_6 = arith.constant 0 : i32
    %c0_i32_7 = arith.constant 0 : i32
    %c0_i32_8 = arith.constant 0 : i32
    %11 = tpu.memref_slice %arg8[%0, %c0_i32_6, %c0_i32_7, %c0_i32_8] : memref<2x6x18x128xf32, #tpu.memory_space<vmem>> -> memref<1x6x18x128xf32, #tpu.memory_space<vmem>>
    %12 = tpu.memref_squeeze %11 : memref<1x6x18x128xf32, #tpu.memory_space<vmem>> -> memref<6x18x128xf32, #tpu.memory_space<vmem>>
    %13 = tpu.memref_slice %arg9[%0] : memref<2x!tpu.dma_semaphore, #tpu.memory_space<semaphore_mem>> -> memref<1x!tpu.dma_semaphore, #tpu.memory_space<semaphore_mem>>
    %14 = tpu.memref_squeeze %13 : memref<1x!tpu.dma_semaphore, #tpu.memory_space<semaphore_mem>> -> memref<!tpu.dma_semaphore, #tpu.memory_space<semaphore_mem>>
    tpu.wait_dma2 semaphore(%14 : memref<!tpu.dma_semaphore, #tpu.memory_space<semaphore_mem>>) src(%10 : memref<6x18x128xf32, #tpu.memory_space<any>>) dst(%12 : memref<6x18x128xf32, #tpu.memory_space<vmem>>)
    %c0_i32_9 = arith.constant 0 : i32
    %c0_i32_10 = arith.constant 0 : i32
    %c0_i32_11 = arith.constant 0 : i32
    %15 = tpu.memref_slice %arg8[%0, %c0_i32_9, %c0_i32_10, %c0_i32_11] : memref<2x6x18x128xf32, #tpu.memory_space<vmem>> -> memref<1x6x18x128xf32, #tpu.memory_space<vmem>>
    %16 = tpu.memref_squeeze %15 : memref<1x6x18x128xf32, #tpu.memory_space<vmem>> -> memref<6x18x128xf32, #tpu.memory_space<vmem>>
    %c0 = arith.constant 0 : index
    %c0_12 = arith.constant 0 : index
    %c0_13 = arith.constant 0 : index
    %17 = vector.load %16[%c0, %c0_12, %c0_13] : memref<6x18x128xf32, #tpu.memory_space<vmem>>, vector<6x16x128xf32>
    %c0_14 = arith.constant 0 : index
    %c0_15 = arith.constant 0 : index
    %18 = vector.load %arg3[%c0_14, %c0_15] : memref<9x128xf32, #tpu.memory_space<vmem>>, vector<1x128xf32>
    %19 = vector.shape_cast %18 : vector<1x128xf32> to vector<128xf32>
    %20 = vector.extract_strided_slice %17 {offsets = [0, 0, 0], sizes = [4, 16, 128], strides = [1, 1, 1]} : vector<6x16x128xf32> to vector<4x16x128xf32>
    %21 = vector.shape_cast %19 : vector<128xf32> to vector<1x1x128xf32>
    %22 = vector.broadcast %21 : vector<1x1x128xf32> to vector<4x16x128xf32>
    %23 = arith.mulf %20, %22 : vector<4x16x128xf32>
    %c3 = arith.constant 3 : index
    %c0_16 = arith.constant 0 : index
    %24 = vector.load %arg3[%c3, %c0_16] : memref<9x128xf32, #tpu.memory_space<vmem>>, vector<1x128xf32>
    %25 = vector.shape_cast %24 : vector<1x128xf32> to vector<128xf32>
    %26 = vector.extract_strided_slice %17 {offsets = [1, 0, 0], sizes = [4, 16, 128], strides = [1, 1, 1]} : vector<6x16x128xf32> to vector<4x16x128xf32>
    %27 = vector.shape_cast %25 : vector<128xf32> to vector<1x1x128xf32>
    %28 = vector.broadcast %27 : vector<1x1x128xf32> to vector<4x16x128xf32>
    %29 = arith.mulf %26, %28 : vector<4x16x128xf32>
    %30 = arith.addf %23, %29 : vector<4x16x128xf32>
    %c6 = arith.constant 6 : index
    %c0_17 = arith.constant 0 : index
    %31 = vector.load %arg3[%c6, %c0_17] : memref<9x128xf32, #tpu.memory_space<vmem>>, vector<1x128xf32>
    %32 = vector.shape_cast %31 : vector<1x128xf32> to vector<128xf32>
    %33 = vector.extract_strided_slice %17 {offsets = [2, 0, 0], sizes = [4, 16, 128], strides = [1, 1, 1]} : vector<6x16x128xf32> to vector<4x16x128xf32>
    %34 = vector.shape_cast %32 : vector<128xf32> to vector<1x1x128xf32>
    %35 = vector.broadcast %34 : vector<1x1x128xf32> to vector<4x16x128xf32>
    %36 = arith.mulf %33, %35 : vector<4x16x128xf32>
    %37 = arith.addf %30, %36 : vector<4x16x128xf32>
    %c0_i32_18 = arith.constant 0 : i32
    %c0_i32_19 = arith.constant 0 : i32
    %c0_i32_20 = arith.constant 0 : i32
    %38 = tpu.memref_slice %arg8[%0, %c0_i32_18, %c0_i32_19, %c0_i32_20] : memref<2x6x18x128xf32, #tpu.memory_space<vmem>> -> memref<1x6x18x128xf32, #tpu.memory_space<vmem>>
    %39 = tpu.memref_squeeze %38 : memref<1x6x18x128xf32, #tpu.memory_space<vmem>> -> memref<6x18x128xf32, #tpu.memory_space<vmem>>
    %c0_21 = arith.constant 0 : index
    %c1 = arith.constant 1 : index
    %c0_22 = arith.constant 0 : index
    %40 = vector.load %39[%c0_21, %c1, %c0_22] : memref<6x18x128xf32, #tpu.memory_space<vmem>>, vector<6x16x128xf32>
    %c1_23 = arith.constant 1 : index
    %c0_24 = arith.constant 0 : index
    %41 = vector.load %arg3[%c1_23, %c0_24] : memref<9x128xf32, #tpu.memory_space<vmem>>, vector<1x128xf32>
    %42 = vector.shape_cast %41 : vector<1x128xf32> to vector<128xf32>
    %43 = vector.extract_strided_slice %40 {offsets = [0, 0, 0], sizes = [4, 16, 128], strides = [1, 1, 1]} : vector<6x16x128xf32> to vector<4x16x128xf32>
    %44 = vector.shape_cast %42 : vector<128xf32> to vector<1x1x128xf32>
    %45 = vector.broadcast %44 : vector<1x1x128xf32> to vector<4x16x128xf32>
    %46 = arith.mulf %43, %45 : vector<4x16x128xf32>
    %47 = arith.addf %37, %46 : vector<4x16x128xf32>
    %c4 = arith.constant 4 : index
    %c0_25 = arith.constant 0 : index
    %48 = vector.load %arg3[%c4, %c0_25] : memref<9x128xf32, #tpu.memory_space<vmem>>, vector<1x128xf32>
    %49 = vector.shape_cast %48 : vector<1x128xf32> to vector<128xf32>
    %50 = vector.extract_strided_slice %40 {offsets = [1, 0, 0], sizes = [4, 16, 128], strides = [1, 1, 1]} : vector<6x16x128xf32> to vector<4x16x128xf32>
    %51 = vector.shape_cast %49 : vector<128xf32> to vector<1x1x128xf32>
    %52 = vector.broadcast %51 : vector<1x1x128xf32> to vector<4x16x128xf32>
    %53 = arith.mulf %50, %52 : vector<4x16x128xf32>
    %54 = arith.addf %47, %53 : vector<4x16x128xf32>
    %c7 = arith.constant 7 : index
    %c0_26 = arith.constant 0 : index
    %55 = vector.load %arg3[%c7, %c0_26] : memref<9x128xf32, #tpu.memory_space<vmem>>, vector<1x128xf32>
    %56 = vector.shape_cast %55 : vector<1x128xf32> to vector<128xf32>
    %57 = vector.extract_strided_slice %40 {offsets = [2, 0, 0], sizes = [4, 16, 128], strides = [1, 1, 1]} : vector<6x16x128xf32> to vector<4x16x128xf32>
    %58 = vector.shape_cast %56 : vector<128xf32> to vector<1x1x128xf32>
    %59 = vector.broadcast %58 : vector<1x1x128xf32> to vector<4x16x128xf32>
    %60 = arith.mulf %57, %59 : vector<4x16x128xf32>
    %61 = arith.addf %54, %60 : vector<4x16x128xf32>
    %c0_i32_27 = arith.constant 0 : i32
    %c0_i32_28 = arith.constant 0 : i32
    %c0_i32_29 = arith.constant 0 : i32
    %62 = tpu.memref_slice %arg8[%0, %c0_i32_27, %c0_i32_28, %c0_i32_29] : memref<2x6x18x128xf32, #tpu.memory_space<vmem>> -> memref<1x6x18x128xf32, #tpu.memory_space<vmem>>
    %63 = tpu.memref_squeeze %62 : memref<1x6x18x128xf32, #tpu.memory_space<vmem>> -> memref<6x18x128xf32, #tpu.memory_space<vmem>>
    %c0_30 = arith.constant 0 : index
    %c2 = arith.constant 2 : index
    %c0_31 = arith.constant 0 : index
    %64 = vector.load %63[%c0_30, %c2, %c0_31] : memref<6x18x128xf32, #tpu.memory_space<vmem>>, vector<6x16x128xf32>
    %c2_32 = arith.constant 2 : index
    %c0_33 = arith.constant 0 : index
    %65 = vector.load %arg3[%c2_32, %c0_33] : memref<9x128xf32, #tpu.memory_space<vmem>>, vector<1x128xf32>
    %66 = vector.shape_cast %65 : vector<1x128xf32> to vector<128xf32>
    %67 = vector.extract_strided_slice %64 {offsets = [0, 0, 0], sizes = [4, 16, 128], strides = [1, 1, 1]} : vector<6x16x128xf32> to vector<4x16x128xf32>
    %68 = vector.shape_cast %66 : vector<128xf32> to vector<1x1x128xf32>
    %69 = vector.broadcast %68 : vector<1x1x128xf32> to vector<4x16x128xf32>
    %70 = arith.mulf %67, %69 : vector<4x16x128xf32>
    %71 = arith.addf %61, %70 : vector<4x16x128xf32>
    %c5 = arith.constant 5 : index
    %c0_34 = arith.constant 0 : index
    %72 = vector.load %arg3[%c5, %c0_34] : memref<9x128xf32, #tpu.memory_space<vmem>>, vector<1x128xf32>
    %73 = vector.shape_cast %72 : vector<1x128xf32> to vector<128xf32>
    %74 = vector.extract_strided_slice %64 {offsets = [1, 0, 0], sizes = [4, 16, 128], strides = [1, 1, 1]} : vector<6x16x128xf32> to vector<4x16x128xf32>
    %75 = vector.shape_cast %73 : vector<128xf32> to vector<1x1x128xf32>
    %76 = vector.broadcast %75 : vector<1x1x128xf32> to vector<4x16x128xf32>
    %77 = arith.mulf %74, %76 : vector<4x16x128xf32>
    %78 = arith.addf %71, %77 : vector<4x16x128xf32>
    %c8 = arith.constant 8 : index
    %c0_35 = arith.constant 0 : index
    %79 = vector.load %arg3[%c8, %c0_35] : memref<9x128xf32, #tpu.memory_space<vmem>>, vector<1x128xf32>
    %80 = vector.shape_cast %79 : vector<1x128xf32> to vector<128xf32>
    %81 = vector.extract_strided_slice %64 {offsets = [2, 0, 0], sizes = [4, 16, 128], strides = [1, 1, 1]} : vector<6x16x128xf32> to vector<4x16x128xf32>
    %82 = vector.shape_cast %80 : vector<128xf32> to vector<1x1x128xf32>
    %83 = vector.broadcast %82 : vector<1x1x128xf32> to vector<4x16x128xf32>
    %84 = arith.mulf %81, %83 : vector<4x16x128xf32>
    %85 = arith.addf %78, %84 : vector<4x16x128xf32>
    %c0_36 = arith.constant 0 : index
    %c0_37 = arith.constant 0 : index
    %86 = vector.load %arg4[%c0_36, %c0_37] : memref<1x128xf32, #tpu.memory_space<vmem>>, vector<1x128xf32>
    %87 = vector.shape_cast %86 : vector<1x128xf32> to vector<128xf32>
    %88 = vector.shape_cast %87 : vector<128xf32> to vector<1x1x128xf32>
    %89 = vector.broadcast %88 : vector<1x1x128xf32> to vector<4x16x128xf32>
    %90 = arith.addf %85, %89 : vector<4x16x128xf32>
    %cst = arith.constant 0.000000e+00 : f32
    %91 = vector.broadcast %cst : f32 to vector<4x16x128xf32>
    %92 = arith.maximumf %90, %91 : vector<4x16x128xf32>
    %c0_38 = arith.constant 0 : index
    %c0_39 = arith.constant 0 : index
    %c0_40 = arith.constant 0 : index
    %c0_41 = arith.constant 0 : index
    %93 = vector.load %arg5[%c0_38, %c0_39, %c0_40, %c0_41] : memref<1x4x16x128xf32, #tpu.memory_space<vmem>>, vector<1x4x16x128xf32>
    %94 = vector.shape_cast %93 : vector<1x4x16x128xf32> to vector<4x16x128xf32>
    %95 = vector.shape_cast %92 : vector<4x16x128xf32> to vector<1x4x16x128xf32>
    tpu.vector_store %arg5[%c0_38, %c0_39, %c0_40, %c0_41], %95 {strides = array<i32>} : memref<1x4x16x128xf32, #tpu.memory_space<vmem>>, vector<1x4x16x128xf32>,
    %cst_42 = arith.constant dense<0.000000e+00> : vector<16x128xf32>
    %96 = vector.multi_reduction <add>, %92, %cst_42 [0] : vector<4x16x128xf32> to vector<16x128xf32>
    %cst_43 = arith.constant dense<0.000000e+00> : vector<128xf32>
    %97 = vector.multi_reduction <add>, %96, %cst_43 [0] : vector<16x128xf32> to vector<128xf32>
    %98 = arith.mulf %92, %92 : vector<4x16x128xf32>
    %cst_44 = arith.constant dense<0.000000e+00> : vector<16x128xf32>
    %99 = vector.multi_reduction <add>, %98, %cst_44 [0] : vector<4x16x128xf32> to vector<16x128xf32>
    %cst_45 = arith.constant dense<0.000000e+00> : vector<128xf32>
    %100 = vector.multi_reduction <add>, %99, %cst_45 [0] : vector<16x128xf32> to vector<128xf32>
    %c0_46 = arith.constant 0 : index
    %c0_47 = arith.constant 0 : index
    %c0_48 = arith.constant 0 : index
    %101 = vector.load %arg6[%c0_46, %c0_47, %c0_48] : memref<1x1x128xf32, #tpu.memory_space<vmem>>, vector<1x1x128xf32>
    %102 = vector.shape_cast %97 : vector<128xf32> to vector<1x1x128xf32>
    %103 = arith.addf %101, %102 : vector<1x1x128xf32>
    %c0_49 = arith.constant 0 : index
    %c0_50 = arith.constant 0 : index
    %c0_51 = arith.constant 0 : index
    %104 = vector.load %arg6[%c0_49, %c0_50, %c0_51] : memref<1x1x128xf32, #tpu.memory_space<vmem>>, vector<1x1x128xf32>
    tpu.vector_store %arg6[%c0_49, %c0_50, %c0_51], %103 {strides = array<i32>} : memref<1x1x128xf32, #tpu.memory_space<vmem>>, vector<1x1x128xf32>,
    %c0_52 = arith.constant 0 : index
    %c0_53 = arith.constant 0 : index
    %c0_54 = arith.constant 0 : index
    %105 = vector.load %arg7[%c0_52, %c0_53, %c0_54] : memref<1x1x128xf32, #tpu.memory_space<vmem>>, vector<1x1x128xf32>
    %106 = vector.shape_cast %100 : vector<128xf32> to vector<1x1x128xf32>
    %107 = arith.addf %105, %106 : vector<1x1x128xf32>
    %c0_55 = arith.constant 0 : index
    %c0_56 = arith.constant 0 : index
    %c0_57 = arith.constant 0 : index
    %108 = vector.load %arg7[%c0_55, %c0_56, %c0_57] : memref<1x1x128xf32, #tpu.memory_space<vmem>>, vector<1x1x128xf32>
    tpu.vector_store %arg7[%c0_55, %c0_56, %c0_57], %107 {strides = array<i32>} : memref<1x1x128xf32, #tpu.memory_space<vmem>>, vector<1x1x128xf32>,
    return
  }
  func.func @transform_1(%arg0: i32, %arg1: i32) -> (i32, i32) {
    %c0_i32 = arith.constant 0 : i32
    %c0_i32_0 = arith.constant 0 : i32
    %c0_i32_1 = arith.constant 0 : i32
    return %c0_i32, %c0_i32_0 : i32, i32
  }
  func.func @transform_2(%arg0: i32, %arg1: i32) -> (i32, i32) {
    %c0_i32 = arith.constant 0 : i32
    %c0_i32_0 = arith.constant 0 : i32
    %c0_i32_1 = arith.constant 0 : i32
    return %c0_i32, %c0_i32_0 : i32, i32
  }
  func.func @transform_3(%arg0: i32, %arg1: i32) -> (i32, i32, i32, i32) {
    %c0_i32 = arith.constant 0 : i32
    %c0_i32_0 = arith.constant 0 : i32
    %c0_i32_1 = arith.constant 0 : i32
    return %arg0, %arg1, %c0_i32, %c0_i32_0 : i32, i32, i32, i32
  }
  func.func @transform_4(%arg0: i32, %arg1: i32) -> (i32, i32, i32) {
    %c0_i32 = arith.constant 0 : i32
    %c0_i32_0 = arith.constant 0 : i32
    %c0_i32_1 = arith.constant 0 : i32
    return %arg0, %c0_i32, %c0_i32_0 : i32, i32, i32
  }
  func.func @transform_5(%arg0: i32, %arg1: i32) -> (i32, i32, i32) {
    %c0_i32 = arith.constant 0 : i32
    %c0_i32_0 = arith.constant 0 : i32
    %c0_i32_1 = arith.constant 0 : i32
    return %arg0, %c0_i32, %c0_i32_0 : i32, i32, i32
  }
}

</mosaic_0001>

<bundles_post_ra>
// kernel: tpu_custom_call.1
= control target key start
LH: loop header
LB: loop body
LE: loop exit
PB: predicated region body
PF: predicated region fallthrough
CT: control target
= control target key end

     0   :  { %11 = vsyncpa [#allocation5], 0  ;;  %s1776_s0 = inlined_call_operand.vmem [shape: f32[2,18,18,128], index: 0, kind: input, shape index: {}]   ;;  %s1777_s1 = inlined_call_operand.vmem [shape: f32[9,128], index: 1, kind: input, shape index: {}]   ;;  %s1778_s2 = inlined_call_operand.vmem [shape: f32[1,128], index: 2, kind: input, shape index: {}]   ;;  %s1779_s3 = inlined_call_operand.hbm [shape: f32[2,16,16,128], index: 3, kind: output, shape index: {0}]   ;;  %s1780_s4 = inlined_call_operand.hbm [shape: f32[2,1,128], index: 4, kind: output, shape index: {1}]   ;;  %s1781_s5 = inlined_call_operand.hbm [shape: f32[2,1,128], index: 5, kind: output, shape index: {2}]  }
   0x1   :  { %13 = vsyncpa [#allocation5 + $0x1], 0 }
   0x2   :  { %14 = vsyncpa [#allocation7], 0 }
   0x3   :  { %16 = vsyncpa [#allocation7 + $0x1], 0  ;;  %s1333_s18 = smov 0   ;;  %s1335_s19 = smov 0  }
   0x4   :  { %s1337_s20 = smov 0   ;;  %s1339_s21 = smov 0  }
   0x5   :  { %s1341_s22 = smov 0   ;;  %s1343_s23 = smov 0  }
   0x6   :  { %s1345_s24 = smov 0   ;;  %s1347_s25 = smov 0  }
   0x7   :  { %s1349_s26 = smov 0   ;;  %s1351_s27 = smov 0  }
   0x8   :  { %s1353_s28 = smov 0  }
   0x9 LB: > { %1790 = sst [smem:[#allocation14_spill]] %s1275_s23  ;;  %s1783_s29 = sadd.s32 4294967295, %s1295_s28   ;;  %s1295_s28 = sphi %s1353_s28, %s22_s28   ;;  %s1291_s27 = sphi %s1351_s27, %s1810_s27   ;;  %s1287_s26 = sphi %s1349_s26, %s1809_s26   ;;  %s1283_s25 = sphi %s1347_s25, %s1808_s25   ;;  %s1279_s24 = sphi %s1345_s24, %s1807_s24   ;;  %s1275_s23 = sphi %s1343_s23, %s1806_s23   ;;  %s1271_s22 = sphi %s1341_s22, %s1815_s22   ;;  %s1267_s21 = sphi %s1339_s21, %s1814_s21   ;;  %s1263_s20 = sphi %s1337_s20, %s1813_s20   ;;  %s1259_s19 = sphi %s1335_s19, %s1812_s19   ;;  %s1255_s18 = sphi %s1333_s18, %s1811_s18  }
   0xa   : > { %1791 = sst [smem:[#allocation15_spill]] %s1287_s26  ;;  %s1782_s30 = sadd.s32 4294967294, %s1295_s28  }
   0xb   : > { %1792 = sst [smem:[#allocation16_spill]] %s1291_s27  ;;  %s31_s6 = sadd.s32 1, %s1287_s26 }
   0xc   : > { %s34_s7 = sadd.s32 1, %s1291_s27  ;;  %p32_p0 = scmp.ge.s32.totalorder %s31_s6, 4 }
   0xd   : > { %s85_s8 = sadd.s32 1, %s1275_s23  ;;  %p95_p1 = scmp.ne.s32.totalorder %s1275_s23, %s1271_s22 }
   0xe   : > { %p1397_p2 = scmp.eq.s32.totalorder %s1783_s29, 7  ;;  %s1817_s6 = smov (%p32_p0, %s31_s6), 0 }
   0xf   : > { %1794 = sst [smem:[#allocation17_spill]] %s1817_s6  ;;  %s1819_s7 = smov (!%p32_p0, %s34_s7), %s1291_s27 }
  0x10   : > { %s81_s10 = ssub.s32 %s1287_s26, %s1817_s6  ;;  %p1408_p3 = por %p1397_p2, %p95_p1 }
  0x11   : > { %p36_p4 = scmp.ge.s32.totalorder %s1819_s7, 2  ;;  %p101_p5 = scmp.ne.s32.totalorder %s1271_s22, %s1267_s21 }
  0x12   : > { %p1416_p6 = scmp.eq.s32.totalorder %s1782_s30, 7  ;;  %s111_s13 = sadd.s32 1, %s1263_s20 }
  0x13   : > { %s1821_s7 = smov (%p36_p4, %s1819_s7), 0  ;;  %p121_p8 = scmp.ne.s32.totalorder %s1263_s20, %s1259_s19 }
  0x14   : > { %1797 = sst [smem:[#allocation18_spill]] %s1821_s7  ;;  %p1425_p7 = por %p1416_p6, %p101_p5 }
  0x15   : > { %s80_s15 = ssub.s32 %s1291_s27, %s1821_s7  ;;  %p127_p9 = scmp.ne.s32.totalorder %s1259_s19, %s1255_s18 }
  0x16   : > { %s82_s16 = sor.u32 %s81_s10, %s80_s15  ;;  %p109_p10 = scmp.eq.s32.totalorder %s80_s15, 0 }
  0x17   : > { %p83_p11 = scmp.eq.s32.totalorder %s82_s16, 0  ;;  %p1437_p12 = por %p121_p8, %p1397_p2 }
  0x18   : > { %s1442_s30 = scalar_select %p109_p10, %s1263_s20, %s111_s13  }
  0x19   : > { %s1445_s29 = scalar_select %p83_p11, %s1275_s23, %s85_s8  }
  0x1a   : > { %p1449_p13 = por %p127_p9, %p1416_p6  ;;  %p944_p0 = scmp.ge.s32.totalorder %s1295_s28, 1 }
  0x1b   : > { %1800 = sst [smem:[#allocation19_spill]] %s1445_s29  ;;  %p178_p1 = scmp.lt.s32.totalorder %s1295_s28, 9 }
  0x1d   : > { %p179_p4 = pnand %p944_p0, %p178_p1 }
  0x1e   : > { %s1788_s18 = sand.u32 (!%p179_p4), 1, %s1271_s22   ;;  %s199_s9 = sand.u32 (!%p179_p4), 1, %s1259_s19  }
  0x1f   : > { %182 = sbr.rel (%p179_p4) target bundleno = 193 (0xc1), region = 28  ;;  %s945_s10 = sshll.u32 (!%p179_p4), %s1788_s18, 6 }
  0x20   : > { %s1460_s13 = sand.u32 (!%p179_p4), 1, %s1279_s24  ;;  %s1462_s8 = scalar_lea.vmem (!%p179_p4), [#allocation4], %s945_s10 }
  0x21   : > { %s1464_s12 = scalar_lea.vmem (!%p179_p4), [#allocation6], %s199_s9  ;;  %s1466_s15 = scalar_lea.vmem (!%p179_p4), [#allocation8], %s199_s9 }
  0x22   : > { %p946_p2 = scmp.ne.s32.totalorder (!%p179_p4), %s1279_s24, 0 }
  0x26   : > { %212 = sbr.rel (%p946_p2) target bundleno = 55 (0x37), region = 32 }
  0x27   : > { %s213_s16 = smul.u32 (!%p946_p2), 432, %s1283_s25 }
  0x29   : > { %s1473_s26 = scalar_lea.vmem (!%p946_p2), %s1776_s0, %s213_s16 }
  0x2a   : > { %v262_v0 = vld [vmem:[%s1473_s26] sm:$0xff] (!%p946_p2)  ;;  %v264_v1 = vld [vmem:[%s1473_s26 + $0x8] sm:$0xff] (!%p946_p2)  ;;  %v266_v2 = vld [vmem:[%s1473_s26 + $0x18] sm:$0xff] (!%p946_p2) }
  0x2b   : > { %263 = vst [vmem:[#allocation2] sm:$0xff] (!%p946_p2), %v262_v0  ;;  %265 = vst [vmem:[#allocation2 + $0x8] sm:$0xff] (!%p946_p2), %v264_v1  ;;  %v268_v3 = vld [vmem:[%s1473_s26 + $0x20] sm:$0xff] (!%p946_p2)  ;;  %v270_v4 = vld [vmem:[%s1473_s26 + $0x30] sm:$0xff] (!%p946_p2) }
  0x2c   : > { %267 = vst [vmem:[#allocation2 + $0x18] sm:$0xff] (!%p946_p2), %v266_v2  ;;  %v272_v5 = vld [vmem:[%s1473_s26 + $0x38] sm:$0xff] (!%p946_p2)  ;;  %269 = vst [vmem:[#allocation2 + $0x20] sm:$0xff] (!%p946_p2), %v268_v3  ;;  %v274_v6 = vld [vmem:[%s1473_s26 + $0x48] sm:$0xff] (!%p946_p2) }
  0x2d   : > { %271 = vst [vmem:[#allocation2 + $0x30] sm:$0xff] %v270_v4  ;;  %273 = vst [vmem:[#allocation2 + $0x38] sm:$0xff] %v272_v5  ;;  %v276_v7 = vld [vmem:[%s1473_s26 + $0x50] sm:$0xff]  ;;  %v278_v8 = vld [vmem:[%s1473_s26 + $0x60] sm:$0xff] }
  0x2e   : > { %275 = vst [vmem:[#allocation2 + $0x48] sm:$0xff] %v274_v6  ;;  %277 = vst [vmem:[#allocation2 + $0x50] sm:$0xff] %v276_v7  ;;  %v280_v9 = vld [vmem:[%s1473_s26 + $0x68] sm:$0xff]  ;;  %v282_v10 = vld [vmem:[%s1473_s26 + $0x78] sm:$0xff] }
  0x2f   : > { %279 = vst [vmem:[#allocation2 + $0x60] sm:$0xff] %v278_v8  ;;  %v284_v11 = vld [vmem:[%s1473_s26 + $0x80] sm:$0xff]  ;;  %281 = vst [vmem:[#allocation2 + $0x68] sm:$0xff] %v280_v9  ;;  %v947_v12 = vld [vmem:[%s1473_s26 + $0x10] sm:$0x3] }
  0x30   : > { %283 = vst [vmem:[#allocation2 + $0x78] sm:$0xff] %v282_v10  ;;  %285 = vst [vmem:[#allocation2 + $0x80] sm:$0xff] %v284_v11  ;;  %v948_v13 = vld [vmem:[%s1473_s26 + $0x28] sm:$0x3]  ;;  %v949_v14 = vld [vmem:[%s1473_s26 + $0x40] sm:$0x3] }
  0x31   : > { %296 = vst [vmem:[#allocation2 + $0x10] sm:$0x3] %v947_v12  ;;  %298 = vst [vmem:[#allocation2 + $0x28] sm:$0x3] %v948_v13  ;;  %v950_v15 = vld [vmem:[%s1473_s26 + $0x58] sm:$0x3] }
  0x32   : > { %300 = vst [vmem:[#allocation2 + $0x40] sm:$0x3] %v949_v14  ;;  %v951_v16 = vld [vmem:[%s1473_s26 + $0x70] sm:$0x3]  ;;  %v952_v17 = vld [vmem:[%s1473_s26 + $0x88] sm:$0x3] }
  0x33   : > { %302 = vst [vmem:[#allocation2 + $0x58] sm:$0x3] %v950_v15  ;;  %304 = vst [vmem:[#allocation2 + $0x70] sm:$0x3] %v951_v16 }
  0x34   : > { %306 = vst [vmem:[#allocation2 + $0x88] sm:$0x3] %v952_v17 }
  0x35   : > { %310 = vsyncadd [#allocation3], 1728  ;;  %v1297_v18 = vmov 0.0  }
  0x36   : > { %311 = vst [vmem:[%s1464_s12] sm:$0x1] %v1297_v18  ;;  %312 = vst [vmem:[%s1466_s15] sm:$0x1] %v1297_v18 }
  0x37 PF: > { %s313_s27 = sadd.s32 1, %s1279_s24 }
  0x38   : > { %p953_p5 = scmp.ge.s32.totalorder %s313_s27, 4 }
  0x39   : > { %s318_s7 = ssub.s32 (!%p953_p5), 1, %s1460_s13  ;;  %s836_s26 = smul.u32 (!%p953_p5), 96, %s1279_s24 }
  0x3a   : > { %317 = sbr.rel (%p953_p5) target bundleno = 75 (0x4b), region = 73  ;;  %s326_s29 = scalar_lea.sflag (!%p953_p5), [#allocation3], %s318_s7 }
  0x3b   : > { %s837_s9 = smul.u32 (!%p953_p5), 432, %s1283_s25 }
  0x3c   : > { %s324_s10 = smul.u32 (!%p953_p5), 144, %s318_s7 }
  0x3d   : > { %s838_s16 = sadd.s32 (!%p953_p5), %s837_s9, %s836_s26 }
  0x3e   : > { %s1504_s23 = scalar_lea.vmem (!%p953_p5), %s1776_s0, %s838_s16  ;;  %s1509_s27 = scalar_lea.vmem (!%p953_p5), [#allocation2], %s324_s10 }
  0x3f   : > { %v955_v19 = vld [vmem:[%s1504_s23 + $0x60] sm:$0xff] (!%p953_p5)  ;;  %v956_v20 = vld [vmem:[%s1504_s23 + $0x68] sm:$0xff] (!%p953_p5)  ;;  %v957_v21 = vld [vmem:[%s1504_s23 + $0x78] sm:$0xff] (!%p953_p5) }
  0x40   : > { %375 = vst [vmem:[%s1509_s27] sm:$0xff] (!%p953_p5), %v955_v19  ;;  %377 = vst [vmem:[%s1509_s27 + $0x8] sm:$0xff] (!%p953_p5), %v956_v20  ;;  %v958_v22 = vld [vmem:[%s1504_s23 + $0x80] sm:$0xff] (!%p953_p5)  ;;  %v959_v23 = vld [vmem:[%s1504_s23 + $0x90] sm:$0xff] (!%p953_p5) }
  0x41   : > { %379 = vst [vmem:[%s1509_s27 + $0x18] sm:$0xff] %v957_v21  ;;  %v960_v24 = vld [vmem:[%s1504_s23 + $0x98] sm:$0xff]  ;;  %381 = vst [vmem:[%s1509_s27 + $0x20] sm:$0xff] %v958_v22  ;;  %v961_v25 = vld [vmem:[%s1504_s23 + $0xa8] sm:$0xff] }
  0x42   : > { %383 = vst [vmem:[%s1509_s27 + $0x30] sm:$0xff] %v959_v23  ;;  %385 = vst [vmem:[%s1509_s27 + $0x38] sm:$0xff] %v960_v24  ;;  %v962_v26 = vld [vmem:[%s1504_s23 + $0xb0] sm:$0xff]  ;;  %v963_v27 = vld [vmem:[%s1504_s23 + $0xc0] sm:$0xff] }
  0x43   : > { %387 = vst [vmem:[%s1509_s27 + $0x48] sm:$0xff] %v961_v25  ;;  %389 = vst [vmem:[%s1509_s27 + $0x50] sm:$0xff] %v962_v26  ;;  %v964_v28 = vld [vmem:[%s1504_s23 + $0xc8] sm:$0xff]  ;;  %v965_v29 = vld [vmem:[%s1504_s23 + $0xd8] sm:$0xff] }
  0x44   : > { %391 = vst [vmem:[%s1509_s27 + $0x60] sm:$0xff] %v963_v27  ;;  %v966_v30 = vld [vmem:[%s1504_s23 + $0xe0] sm:$0xff]  ;;  %393 = vst [vmem:[%s1509_s27 + $0x68] sm:$0xff] %v964_v28  ;;  %v967_v31 = vld [vmem:[%s1504_s23 + $0x70] sm:$0x3] }
  0x45   : > { %395 = vst [vmem:[%s1509_s27 + $0x78] sm:$0xff] %v965_v29  ;;  %397 = vst [vmem:[%s1509_s27 + $0x80] sm:$0xff] %v966_v30  ;;  %v969_v32 = vld [vmem:[%s1504_s23 + $0x88] sm:$0x3]  ;;  %v971_v33 = vld [vmem:[%s1504_s23 + $0xa0] sm:$0x3] }
  0x46   : > { %968 = vst [vmem:[%s1509_s27 + $0x10] sm:$0x3] %v967_v31  ;;  %970 = vst [vmem:[%s1509_s27 + $0x28] sm:$0x3] %v969_v32  ;;  %v973_v34 = vld [vmem:[%s1504_s23 + $0xb8] sm:$0x3] }
  0x47   : > { %972 = vst [vmem:[%s1509_s27 + $0x40] sm:$0x3] %v971_v33  ;;  %v975_v35 = vld [vmem:[%s1504_s23 + $0xd0] sm:$0x3]  ;;  %v977_v36 = vld [vmem:[%s1504_s23 + $0xe8] sm:$0x3] }
  0x48   : > { %974 = vst [vmem:[%s1509_s27 + $0x58] sm:$0x3] %v973_v34  ;;  %976 = vst [vmem:[%s1509_s27 + $0x70] sm:$0x3] %v975_v35 }
  0x49   : > { %978 = vst [vmem:[%s1509_s27 + $0x88] sm:$0x3] %v977_v36 }
  0x4a   : > { %422 = vsyncadd %s326_s29, 1728 }
  0x4b PF: > { %s423_s18 = smul.u32 144, %s1460_s13  ;;  %s425_s9 = scalar_lea.sflag [#allocation3], %s1460_s13 }
  0x4d   : > { %s1547_s26 = scalar_lea.vmem [#allocation2], %s423_s18 }
  0x4e   : > { %1243 = dma.done.wait %s425_s9, 1728 }
  0x4f   : > { %1244 = vsyncadd %s425_s9, 4294965568  ;;  %v985_v44 = vld [vmem:[%s1777_s1] ss:$0 sm:$0xff]  ;;  %v986_v45 = vld [vmem:[%s1777_s1 + $0x3] ss:$0 sm:$0xff]  ;;  %s1006_s23 = sshll.u32 %s1279_s24, 3 }
  0x50   : > { %v987_v1 = vld [vmem:[%s1777_s1 + $0x6] ss:$0 sm:$0xff]  ;;  %v988_v25 = vld [vmem:[%s1777_s1 + $0x1] ss:$0 sm:$0xff]  ;;  %s998_s13 = sshll.u32 %s1283_s25, 5  ;;  %s743_s16 = sshll.u32 %s1462_s8, 4  ;;  %s1627_s16 = int_to_ptr.vmem [resolvable:$true] %s743_s16 }
  0x51   : > { %v441_v3 = vld [vmem:[%s1547_s26 + $0x80] sm:$0xff]  ;;  %v501_v24 = vld [vmem:[%s1547_s26 + $0x31] sm:$0xff]  ;;  %s1615_s7 = sadd.s32 %s1006_s23, %s998_s13  ;;  %s1802_s9 = sand.u32 1, %s1271_s22  }
  0x52   : > { %v430_v37 = vld [vmem:[%s1547_s26] sm:$0xff]  ;;  %v431_v38 = vld [vmem:[%s1547_s26 + $0x8] sm:$0xff]  ;;  %v432_v39 = vld [vmem:[%s1547_s26 + $0x18] sm:$0xff]  ;;  %v488_v22 = vmul.f32 %v987_v1, %v441_v3  ;;  %s999_s10 = sshll.u32 %s1615_s7, 7  ;;  %s1639_s23 = scalar_lea.sflag [#allocation5], %s1802_s9 }
  0x53   : > { %v433_v40 = vld [vmem:[%s1547_s26 + $0x20] sm:$0xff]  ;;  %v434_v41 = vld [vmem:[%s1547_s26 + $0x30] sm:$0xff]  ;;  %v435_v42 = vld [vmem:[%s1547_s26 + $0x38] sm:$0xff]  ;;  %v447_v49 = vmul.f32 %v985_v44, %v430_v37  ;;  %v448_v50 = vmul.f32 %v985_v44, %v431_v38  ;;  %v449_v51 = vmul.f32 %v985_v44, %v432_v39  ;;  %v460_v57 = vmul.f32 %v986_v45, %v432_v39  ;;  %s1625_s18 = scalar_lea.hbm %s1779_s3, %s999_s10  ;;  %s1115_s13 = scalar_lea.vmem %s1627_s16, 1024 }
  0x54   : > { %v436_v43 = vld [vmem:[%s1547_s26 + $0x48] sm:$0xff]  ;;  %v437_v46 = vld [vmem:[%s1547_s26 + $0x50] sm:$0xff]  ;;  %v438_v47 = vld [vmem:[%s1547_s26 + $0x60] sm:$0xff]  ;;  %v450_v52 = vmul.f32 %v985_v44, %v433_v40  ;;  %v451_v53 = vmul.f32 %v985_v44, %v434_v41  ;;  %v452_v54 = vmul.f32 %v985_v44, %v435_v42  ;;  %v461_v58 = vmul.f32 %v986_v45, %v433_v40  ;;  %p1116_p6 = scmp.ne.s32.totalorder %s1627_s16, %s1115_s13  ;;  %s1298_s7 = smov [#allocation4]  }
  0x55   : > { %v439_v48 = vld [vmem:[%s1547_s26 + $0x68] sm:$0xff]  ;;  %v453_v55 = vmul.f32 %v985_v44, %v436_v43  ;;  %v454_v56 = vmul.f32 %v985_v44, %v437_v46  ;;  %v462_v59 = vmul.f32 %v986_v45, %v434_v41  ;;  %v463_v60 = vmul.f32 %v986_v45, %v435_v42  ;;  %v440_v2 = vld [vmem:[%s1547_s26 + $0x78] sm:$0xff]  ;;  %s1119_s24 = sshll.u32 %s1298_s7, 4  ;;  %s1120_s24 = int_to_ptr.vmem [resolvable:$false] %s1119_s24 }
  0x56   : > { %v464_v61 = vmul.f32 %v986_v45, %v436_v43  ;;  %v465_v62 = vmul.f32 %v986_v45, %v437_v46  ;;  %v466_v63 = vmul.f32 %v986_v45, %v438_v47  ;;  %v467_v0 = vmul.f32 %v986_v45, %v439_v48  ;;  %v497_v16 = vld [vmem:[%s1547_s26 + $0x1] sm:$0xff]  ;;  %v498_v17 = vld [vmem:[%s1547_s26 + $0x9] sm:$0xff]  ;;  %v499_v18 = vld [vmem:[%s1547_s26 + $0x19] sm:$0xff]  ;;  %p1117_p8 = pnand %p1116_p6, %p1408_p3  ;;  %p1122_p10 = scmp.lt.s32.totalorder %s1627_s16, %s1120_s24 }
  0x57   : > { %v468_v4 = vadd.f32 %v460_v57, %v447_v49  ;;  %v469_v5 = vadd.f32 %v461_v58, %v448_v50  ;;  %v470_v6 = vadd.f32 %v462_v59, %v449_v51  ;;  %v471_v7 = vadd.f32 %v463_v60, %v450_v52  ;;  %v500_v23 = vld [vmem:[%s1547_s26 + $0x21] sm:$0xff]  ;;  %v502_v30 = vld [vmem:[%s1547_s26 + $0x39] sm:$0xff]  ;;  %v503_v31 = vld [vmem:[%s1547_s26 + $0x49] sm:$0xff] }
  0x58   : > { %v472_v8 = vadd.f32 %v464_v61, %v451_v53  ;;  %v473_v9 = vadd.f32 %v465_v62, %v452_v54  ;;  %v474_v10 = vadd.f32 %v466_v63, %v453_v55  ;;  %v475_v11 = vadd.f32 %v467_v0, %v454_v56  ;;  %v504_v32 = vld [vmem:[%s1547_s26 + $0x51] sm:$0xff]  ;;  %p1118_p9 = pneg %p1117_p8 }
  0x59   : > { %v481_v12 = vmul.f32 %v987_v1, %v434_v41  ;;  %v482_v13 = vmul.f32 %v987_v1, %v435_v42  ;;  %v483_v14 = vmul.f32 %v987_v1, %v436_v43  ;;  %v484_v15 = vmul.f32 %v987_v1, %v437_v46  ;;  %v989_v45 = vld [vmem:[%s1777_s1 + $0x4] ss:$0 sm:$0xff]  ;;  %v990_v0 = vld [vmem:[%s1777_s1 + $0x7] ss:$0 sm:$0xff] }
  0x5a   : > { %v485_v19 = vmul.f32 %v987_v1, %v438_v47  ;;  %v486_v20 = vmul.f32 %v987_v1, %v439_v48  ;;  %v487_v21 = vmul.f32 %v987_v1, %v440_v2  ;;  %v496_v36 = vadd.f32 %v488_v22, %v475_v11  ;;  %v505_v46 = vld [vmem:[%s1547_s26 + $0x61] sm:$0xff]  ;;  %v506_v47 = vld [vmem:[%s1547_s26 + $0x69] sm:$0xff]  ;;  %v507_v1 = vld [vmem:[%s1547_s26 + $0x79] sm:$0xff] }
  0x5b   : > { %v489_v26 = vadd.f32 %v481_v12, %v468_v4  ;;  %v490_v27 = vadd.f32 %v482_v13, %v469_v5  ;;  %v491_v28 = vadd.f32 %v483_v14, %v470_v6  ;;  %v492_v29 = vadd.f32 %v484_v15, %v471_v7  ;;  %v508_v2 = vld [vmem:[%s1547_s26 + $0x81] sm:$0xff] }
  0x5c   : > { %v493_v33 = vadd.f32 %v485_v19, %v472_v8  ;;  %v494_v34 = vadd.f32 %v486_v20, %v473_v9  ;;  %v495_v35 = vadd.f32 %v487_v21, %v474_v10  ;;  %v514_v37 = vmul.f32 %v988_v25, %v497_v16  ;;  %v572_v15 = vld [vmem:[%s1547_s26 + $0x2] sm:$0xff]  ;;  %v573_v16 = vld [vmem:[%s1547_s26 + $0xa] sm:$0xff] }
  0x5d   : > { %v515_v38 = vmul.f32 %v988_v25, %v498_v17  ;;  %v516_v39 = vmul.f32 %v988_v25, %v499_v18  ;;  %v517_v40 = vmul.f32 %v988_v25, %v500_v23  ;;  %v518_v41 = vmul.f32 %v988_v25, %v501_v24  ;;  %v574_v17 = vld [vmem:[%s1547_s26 + $0x1a] sm:$0xff]  ;;  %v575_v22 = vld [vmem:[%s1547_s26 + $0x22] sm:$0xff] }
  0x5e   : > { %v519_v42 = vmul.f32 %v988_v25, %v502_v30  ;;  %v520_v43 = vmul.f32 %v988_v25, %v503_v31  ;;  %v521_v44 = vmul.f32 %v988_v25, %v504_v32  ;;  %v522_v48 = vadd.f32 %v514_v37, %v489_v26  ;;  %v991_v25 = vld [vmem:[%s1777_s1 + $0x2] ss:$0 sm:$0xff] }
  0x5f   : > { %v523_v49 = vadd.f32 %v515_v38, %v490_v27  ;;  %v524_v50 = vadd.f32 %v516_v39, %v491_v28  ;;  %v525_v51 = vadd.f32 %v517_v40, %v492_v29  ;;  %v526_v52 = vadd.f32 %v518_v41, %v493_v33  ;;  %v577_v29 = vld [vmem:[%s1547_s26 + $0x3a] sm:$0xff] }
  0x60   : > { %v527_v53 = vadd.f32 %v519_v42, %v494_v34  ;;  %v528_v54 = vadd.f32 %v520_v43, %v495_v35  ;;  %v529_v55 = vadd.f32 %v521_v44, %v496_v36  ;;  %v535_v56 = vmul.f32 %v989_v45, %v499_v18  ;;  %v992_v44 = vld [vmem:[%s1777_s1 + $0x5] ss:$0 sm:$0xff] }
  0x61   : > { %v536_v57 = vmul.f32 %v989_v45, %v500_v23  ;;  %v537_v58 = vmul.f32 %v989_v45, %v501_v24  ;;  %v538_v59 = vmul.f32 %v989_v45, %v502_v30  ;;  %v539_v60 = vmul.f32 %v989_v45, %v503_v31  ;;  %v576_v23 = vld [vmem:[%s1547_s26 + $0x32] sm:$0xff] }
  0x62   : > { %v540_v61 = vmul.f32 %v989_v45, %v504_v32  ;;  %v541_v62 = vmul.f32 %v989_v45, %v505_v46  ;;  %v542_v63 = vmul.f32 %v989_v45, %v506_v47  ;;  %v543_v3 = vadd.f32 %v535_v56, %v522_v48  ;;  %v580_v45 = vld [vmem:[%s1547_s26 + $0x62] sm:$0xff] }
  0x63   : > { %v544_v4 = vadd.f32 %v536_v57, %v523_v49  ;;  %v545_v5 = vadd.f32 %v537_v58, %v524_v50  ;;  %v546_v6 = vadd.f32 %v538_v59, %v525_v51  ;;  %v547_v7 = vadd.f32 %v539_v60, %v526_v52 }
  0x64   : > { %v548_v8 = vadd.f32 %v540_v61, %v527_v53  ;;  %v549_v9 = vadd.f32 %v541_v62, %v528_v54  ;;  %v550_v10 = vadd.f32 %v542_v63, %v529_v55  ;;  %v556_v11 = vmul.f32 %v990_v0, %v501_v24  ;;  %v993_v63 = vld [vmem:[%s1777_s1 + $0x8] ss:$0 sm:$0xff] }
  0x65   : > { %v557_v12 = vmul.f32 %v990_v0, %v502_v30  ;;  %v558_v13 = vmul.f32 %v990_v0, %v503_v31  ;;  %v559_v14 = vmul.f32 %v990_v0, %v504_v32  ;;  %v560_v18 = vmul.f32 %v990_v0, %v505_v46  ;;  %v578_v30 = vld [vmem:[%s1547_s26 + $0x4a] sm:$0xff]  ;;  %v579_v31 = vld [vmem:[%s1547_s26 + $0x52] sm:$0xff] }
  0x66   : > { %v561_v19 = vmul.f32 %v990_v0, %v506_v47  ;;  %v562_v20 = vmul.f32 %v990_v0, %v507_v1  ;;  %v563_v21 = vmul.f32 %v990_v0, %v508_v2  ;;  %v564_v24 = vadd.f32 %v556_v11, %v543_v3  ;;  %v581_v46 = vld [vmem:[%s1547_s26 + $0x6a] sm:$0xff]  ;;  %v582_v0 = vld [vmem:[%s1547_s26 + $0x7a] sm:$0xff]  ;;  %v583_v1 = vld [vmem:[%s1547_s26 + $0x82] sm:$0xff]  ;;  %s1121_s26 = scalar_lea.vmem %s1120_s24, 2048 }
  0x67   : > { %v565_v26 = vadd.f32 %v557_v12, %v544_v4  ;;  %v566_v27 = vadd.f32 %v558_v13, %v545_v5  ;;  %v567_v28 = vadd.f32 %v559_v14, %v546_v6  ;;  %v568_v32 = vadd.f32 %v560_v18, %v547_v7  ;;  %v994_v18 = vld [vmem:[%s1778_s2] ss:$0 sm:$0xff]  ;;  %p1123_p11 = scmp.lt.s32.totalorder %s1121_s26, %s1115_s13 }
  0x68   : > { %v569_v33 = vadd.f32 %v561_v19, %v548_v8  ;;  %v570_v34 = vadd.f32 %v562_v20, %v549_v9  ;;  %v571_v35 = vadd.f32 %v563_v21, %v550_v10  ;;  %v589_v36 = vmul.f32 %v991_v25, %v572_v15 }
  0x69   : > { %v590_v37 = vmul.f32 %v991_v25, %v573_v16  ;;  %v591_v38 = vmul.f32 %v991_v25, %v574_v17  ;;  %v592_v39 = vmul.f32 %v991_v25, %v575_v22  ;;  %v593_v40 = vmul.f32 %v991_v25, %v576_v23  ;;  %p1124_p0 = por %p1123_p11, %p1122_p10 }
  0x6a   : > { %v594_v41 = vmul.f32 %v991_v25, %v577_v29  ;;  %v595_v42 = vmul.f32 %v991_v25, %v578_v30  ;;  %v596_v43 = vmul.f32 %v991_v25, %v579_v31  ;;  %v597_v47 = vadd.f32 %v589_v36, %v564_v24 }
  0x6b   : > { %v598_v48 = vadd.f32 %v590_v37, %v565_v26  ;;  %v599_v49 = vadd.f32 %v591_v38, %v566_v27  ;;  %v600_v50 = vadd.f32 %v592_v39, %v567_v28  ;;  %v601_v51 = vadd.f32 %v593_v40, %v568_v32  ;;  %p1125_p1 = pnand %p1124_p0, %p1118_p9 }
  0x6c   : > { %v602_v52 = vadd.f32 %v594_v41, %v569_v33  ;;  %v603_v53 = vadd.f32 %v595_v42, %v570_v34  ;;  %v604_v54 = vadd.f32 %v596_v43, %v571_v35  ;;  %v610_v55 = vmul.f32 %v992_v44, %v574_v17 }
  0x6d   : > { %v611_v56 = vmul.f32 %v992_v44, %v575_v22  ;;  %v612_v57 = vmul.f32 %v992_v44, %v576_v23  ;;  %v613_v58 = vmul.f32 %v992_v44, %v577_v29  ;;  %v614_v59 = vmul.f32 %v992_v44, %v578_v30 }
  0x6e   : > { %v615_v60 = vmul.f32 %v992_v44, %v579_v31  ;;  %v616_v61 = vmul.f32 %v992_v44, %v580_v45  ;;  %v617_v62 = vmul.f32 %v992_v44, %v581_v46  ;;  %v618_v2 = vadd.f32 %v610_v55, %v597_v47 }
  0x6f   : > { %v619_v3 = vadd.f32 %v611_v56, %v598_v48  ;;  %v620_v4 = vadd.f32 %v612_v57, %v599_v49  ;;  %v621_v5 = vadd.f32 %v613_v58, %v600_v50  ;;  %v622_v6 = vadd.f32 %v614_v59, %v601_v51 }
  0x70   : > { %v623_v7 = vadd.f32 %v615_v60, %v602_v52  ;;  %v624_v8 = vadd.f32 %v616_v61, %v603_v53  ;;  %v625_v9 = vadd.f32 %v617_v62, %v604_v54  ;;  %v631_v10 = vmul.f32 %v993_v63, %v576_v23 }
  0x71   : > { %v632_v11 = vmul.f32 %v993_v63, %v577_v29  ;;  %v633_v12 = vmul.f32 %v993_v63, %v578_v30  ;;  %v634_v13 = vmul.f32 %v993_v63, %v579_v31  ;;  %v635_v14 = vmul.f32 %v993_v63, %v580_v45 }
  0x72   : > { %v636_v15 = vmul.f32 %v993_v63, %v581_v46  ;;  %v637_v16 = vmul.f32 %v993_v63, %v582_v0  ;;  %v638_v17 = vmul.f32 %v993_v63, %v583_v1  ;;  %v639_v19 = vadd.f32 %v631_v10, %v618_v2 }
  0x73   : > { %v640_v20 = vadd.f32 %v632_v11, %v619_v3  ;;  %v641_v21 = vadd.f32 %v633_v12, %v620_v4  ;;  %v642_v22 = vadd.f32 %v634_v13, %v621_v5  ;;  %v643_v23 = vadd.f32 %v635_v14, %v622_v6 }
  0x74   : > { %v644_v25 = vadd.f32 %v636_v15, %v623_v7  ;;  %v645_v24 = vadd.f32 %v637_v16, %v624_v8  ;;  %v646_v26 = vadd.f32 %v638_v17, %v625_v9  ;;  %v654_v27 = vadd.f32 %v994_v18, %v639_v19 }
  0x75   : > { %v655_v28 = vadd.f32 %v994_v18, %v640_v20  ;;  %v656_v29 = vadd.f32 %v994_v18, %v641_v21  ;;  %v657_v30 = vadd.f32 %v994_v18, %v642_v22  ;;  %v658_v31 = vadd.f32 %v994_v18, %v643_v23 }
  0x76   : > { %v659_v32 = vadd.f32 %v994_v18, %v644_v25  ;;  %v660_v33 = vadd.f32 %v994_v18, %v645_v24  ;;  %v661_v34 = vadd.f32 %v994_v18, %v646_v26  ;;  %v662_v35 = vmax.f32 %v654_v27, 0.0 }
  0x77   : > { %v663_v36 = vmax.f32 %v655_v28, 0.0  ;;  %v664_v37 = vmax.f32 %v656_v29, 0.0  ;;  %v665_v38 = vmax.f32 %v657_v30, 0.0  ;;  %v666_v39 = vmax.f32 %v658_v31, 0.0 }
  0x78   : > { %v667_v40 = vmax.f32 %v659_v32, 0.0  ;;  %v668_v41 = vmax.f32 %v660_v33, 0.0  ;;  %v669_v42 = vmax.f32 %v661_v34, 0.0  ;;  %670 = vst [vmem:[%s1462_s8] sm:$0xff] %v662_v35  ;;  %v691_v45 = vmul.f32 %v662_v35, %v662_v35 }
  0x79   : > { %v678_v43 = vadd.f32 %v664_v37, %v662_v35  ;;  %v681_v44 = vadd.f32 %v665_v38, %v663_v36  ;;  %671 = vst [vmem:[%s1462_s8 + $0x8] sm:$0xff] %v663_v36  ;;  %672 = vst [vmem:[%s1462_s8 + $0x10] sm:$0xff] %v664_v37  ;;  %v692_v46 = vmul.f32 %v663_v36, %v663_v36 }
  0x7a   : > { %673 = vst [vmem:[%s1462_s8 + $0x18] sm:$0xff] %v665_v38  ;;  %674 = vst [vmem:[%s1462_s8 + $0x20] sm:$0xff] %v666_v39  ;;  %v693_v47 = vmul.f32 %v664_v37, %v664_v37  ;;  %v694_v48 = vmul.f32 %v665_v38, %v665_v38  ;;  %v695_v49 = vmul.f32 %v666_v39, %v666_v39 }
  0x7b   : > { %675 = vst [vmem:[%s1462_s8 + $0x28] sm:$0xff] %v667_v40  ;;  %676 = vst [vmem:[%s1462_s8 + $0x30] sm:$0xff] %v668_v41  ;;  %v696_v50 = vmul.f32 %v667_v40, %v667_v40  ;;  %v679_v51 = vadd.f32 %v678_v43, %v666_v39  ;;  %v682_v52 = vadd.f32 %v681_v44, %v667_v40 }
  0x7c   : > { %677 = vst [vmem:[%s1462_s8 + $0x38] sm:$0xff] %v669_v42 }
  0x7d   : > { %1128 = shalt.err (!%p1125_p1)
}
  0x7e   : > { %s1129_s8 = scalar_lea.hbm %s1625_s18, 1024  ;;  %s1133_s29 = scalar_lea.hbm %s1779_s3, 8192 }
  0x7f   : > { %p1130_p4 = scmp.ne.s32.totalorder %s1625_s18, %s1129_s8  ;;  %p1134_p6 = scmp.lt.u32.totalorder %s1625_s18, %s1779_s3 }
  0x80   : > { %p1135_p8 = scmp.lt.u32.totalorder %s1133_s29, %s1129_s8  ;;  %p1137_p10 = scmp.lt.u32.totalorder %s1129_s8, %s1625_s18 }
  0x81   : > { %p1131_p2 = pnand %p1130_p4, %p1408_p3 }
  0x82   : > { %p1136_p9 = por %p1135_p8, %p1134_p6 }
  0x83   : > { %p1132_p5 = pneg %p1131_p2 }
  0x84   : > { %p1138_p11 = por %p1137_p10, %p1136_p9 }
  0x86   : > { %p1139_p0 = pnand %p1138_p11, %p1132_p5 }
  0x88   : > { %1142 = shalt.err (!%p1139_p0)
}
  0x89   : > { %s1299_s13 = smov 128   ;;  %s1300_s24 = smov 8   ;;  %v697_v53 = vmul.f32 %v668_v41, %v668_v41  ;;  %v698_v54 = vmul.f32 %v669_v42, %v669_v42  ;;  %v699_v55 = vadd.f32 %v693_v47, %v691_v45  ;;  %v702_v56 = vadd.f32 %v694_v48, %v692_v46  ;;  %v712_v9 = vld [vmem:[%s1464_s12] sm:$0x1] }
  0x8a   : > { %1007 = dma.vmem_to_hbm [thread:$0]  (%p1408_p3), %s1627_s16, 1024, %s1625_s18, %s1639_s23, %s1299_s13, %s1299_s13, %s1300_s24   ;;  %v680_v57 = vadd.f32 %v679_v51, %v668_v41  ;;  %v683_v58 = vadd.f32 %v682_v52, %v669_v42 }
  0x8b   : > { %v700_v59 = vadd.f32 %v699_v55, %v695_v49  ;;  %v703_v60 = vadd.f32 %v702_v56, %v696_v50  ;;  %s1803_s11 = sadd.s32 4294967295, %s1295_s28   ;;  %s1000_s18 = sshll.u32 %s1283_s25, 4  ;;  %v715_v14 = vld [vmem:[%s1466_s15] sm:$0x1] }
  0x8c   : > { %v684_v61 = vadd.f32 %v683_v58, %v680_v57  ;;  %s1665_s16 = sand.u32 1, %s1803_s11   ;;  %s759_s23 = sshll.u32 %s1464_s12, 4  ;;  %s1677_s23 = int_to_ptr.vmem [resolvable:$true] %s759_s23 }
  0x8d   : > { %v701_v62 = vadd.f32 %v700_v59, %v697_v53  ;;  %v704_v63 = vadd.f32 %v703_v60, %v698_v54  ;;  %s772_s26 = sshll.u32 %s1466_s15, 4  ;;  %s1675_s27 = scalar_lea.hbm %s1780_s4, %s1000_s18  ;;  %s1685_s26 = int_to_ptr.vmem [resolvable:$true] %s772_s26 }
  0x8e   : > { %v685_v0 = vrot.slane %v684_v61, 4  ;;  %s1683_s9 = scalar_lea.hbm %s1781_s5, %s1000_s18  ;;  %s724_s7 = scalar_lea.sflag [#allocation7], %s1665_s16 }
  0x8f   : > { %v705_v1 = vadd.f32 %v704_v63, %v701_v62  ;;  %s1143_s13 = scalar_lea.vmem %s1677_s23, 16  ;;  %s1301_s24 = smov [#allocation6]  }
  0x90   : > { %v686_v2 = vadd.f32 %v685_v0, %v684_v61  ;;  %p1144_p3 = scmp.ne.s32.totalorder %s1677_s23, %s1143_s13  ;;  %s1147_s11 = sshll.u32 %s1301_s24, 4  ;;  %s1148_s11 = int_to_ptr.vmem [resolvable:$false] %s1147_s11 }
  0x91   : > { %v706_v3 = vrot.slane %v705_v1, 4  ;;  %s1149_s8 = scalar_lea.vmem %s1148_s11, 32  ;;  %p1150_p2 = scmp.lt.s32.totalorder %s1677_s23, %s1148_s11 }
  0x92   : > { %v687_v4 = vrot.slane %v686_v2, 2  ;;  %p1145_p1 = pnand %p1144_p3, %p1437_p12  ;;  %p1151_p5 = scmp.lt.s32.totalorder %s1149_s8, %s1143_s13 }
  0x93   : > { %v707_v5 = vadd.f32 %v706_v3, %v705_v1 }
  0x94   : > { %v688_v6 = vadd.f32 %v687_v4, %v686_v2  ;;  %p1146_p4 = pneg %p1145_p1  ;;  %p1152_p6 = por %p1151_p5, %p1150_p2 }
  0x95   : > { %v708_v7 = vrot.slane %v707_v5, 2 }
  0x96   : > { %v689_v8 = vrot.slane %v688_v6, 1  ;;  %p1153_p8 = pnand %p1152_p6, %p1146_p4 }
  0x97   : > { %v709_v10 = vadd.f32 %v708_v7, %v707_v5 }
  0x98   : > { %v690_v11 = vadd.f32 %v689_v8, %v688_v6 }
  0x99   : > { %v710_v12 = vrot.slane %v709_v10, 1 }
  0x9a   : > { %v713_v13 = vadd.f32 %v712_v9, %v690_v11 }
  0x9b   : > { %v711_v15 = vadd.f32 %v710_v12, %v709_v10 }
  0x9c   : > { %714 = vst [vmem:[%s1464_s12] sm:$0x1] %v713_v13 }
  0x9d   : > { %v716_v16 = vadd.f32 %v715_v14, %v711_v15 }
  0x9e   : > { %1156 = shalt.err (!%p1153_p8)
}
  0x9f   : > { %s1157_s12 = scalar_lea.hbm %s1675_s27, 16  ;;  %s1161_s25 = scalar_lea.hbm %s1780_s4, 32 }
  0xa0   : > { %p1158_p9 = scmp.ne.s32.totalorder %s1675_s27, %s1157_s12  ;;  %p1162_p0 = scmp.lt.u32.totalorder %s1675_s27, %s1780_s4 }
  0xa1   : > { %p1163_p3 = scmp.lt.u32.totalorder %s1161_s25, %s1157_s12  ;;  %p1165_p4 = scmp.lt.u32.totalorder %s1157_s12, %s1675_s27 }
  0xa2   : > { %p1159_p10 = pnand %p1158_p9, %p1437_p12 }
  0xa3   : > { %p1164_p1 = por %p1163_p3, %p1162_p0 }
  0xa4   : > { %p1160_p11 = pneg %p1159_p10 }
  0xa5   : > { %p1166_p2 = por %p1165_p4, %p1164_p1 }
  0xa7   : > { %p1167_p5 = pnand %p1166_p2, %p1160_p11 }
  0xa9   : > { %1170 = shalt.err (!%p1167_p5)
}
  0xaa   : > { %1008 = dma.vmem_to_hbm [thread:$0]  (%p1437_p12), %s1677_s23, 16, %s1675_s27, %s724_s7   ;;  %717 = vst [vmem:[%s1466_s15] sm:$0x1] %v716_v16 }
  0xab   : > { %s1171_s13 = scalar_lea.vmem %s1685_s26, 16  ;;  %s1302_s11 = smov [#allocation8]  }
  0xac   : > { %p1172_p6 = scmp.ne.s32.totalorder %s1685_s26, %s1171_s13  ;;  %s1175_s8 = sshll.u32 %s1302_s11, 4  ;;  %s1176_s8 = int_to_ptr.vmem [resolvable:$false] %s1175_s8 }
  0xad   : > { %s1177_s12 = scalar_lea.vmem %s1176_s8, 32  ;;  %p1178_p10 = scmp.lt.s32.totalorder %s1685_s26, %s1176_s8 }
  0xae   : > { %p1173_p8 = pnand %p1172_p6, %p1437_p12  ;;  %p1179_p11 = scmp.lt.s32.totalorder %s1177_s12, %s1171_s13 }
  0xb0   : > { %p1174_p9 = pneg %p1173_p8  ;;  %p1180_p0 = por %p1179_p11, %p1178_p10 }
  0xb2   : > { %p1181_p3 = pnand %p1180_p0, %p1174_p9 }
  0xb4   : > { %1184 = shalt.err (!%p1181_p3)
}
  0xb5   : > { %s1185_s15 = scalar_lea.hbm %s1683_s9, 16  ;;  %s1189_s18 = scalar_lea.hbm %s1781_s5, 32 }
  0xb6   : > { %p1186_p1 = scmp.ne.s32.totalorder %s1683_s9, %s1185_s15  ;;  %p1190_p5 = scmp.lt.u32.totalorder %s1683_s9, %s1781_s5 }
  0xb7   : > { %p1191_p6 = scmp.lt.u32.totalorder %s1189_s18, %s1185_s15  ;;  %p1193_p9 = scmp.lt.u32.totalorder %s1185_s15, %s1683_s9 }
  0xb8   : > { %p1187_p4 = pnand %p1186_p1, %p1437_p12 }
  0xb9   : > { %p1192_p8 = por %p1191_p6, %p1190_p5 }
  0xba   : > { %p1188_p2 = pneg %p1187_p4 }
  0xbb   : > { %p1194_p10 = por %p1193_p9, %p1192_p8 }
  0xbd   : > { %p1195_p11 = pnand %p1194_p10, %p1188_p2 }
  0xbf   : > { %1198 = shalt.err (!%p1195_p11)
}
  0xc0   : > { %1009 = dma.vmem_to_hbm [thread:$0]  (%p1437_p12), %s1685_s26, 16, %s1683_s9, %s724_s7  }
  0xc1 PF: > { %p1023_p0 = scmp.ge.s32.totalorder %s1295_s28, 2  ;;  %s784_s29 = sand.u32 1, %s1267_s21  }
  0xc2   : > { %s785_s24 = scalar_lea.sflag [#allocation5], %s784_s29 }
  0xc3   : > { %p1014_p3 = pnand %p1023_p0, %p1425_p7 }
  0xc5   : > { %1246 = dma.done.wait (!%p1014_p3), %s785_s24, 1024  }
  0xc6   : > { %1248 = vsyncadd (!%p1014_p3), %s785_s24, 4294966272  ;;  %s1804_s13 = sadd.s32 4294967294, %s1295_s28   ;;  %p1017_p1 = pnand %p1023_p0, %p1449_p13 }
  0xc7   : > { %s793_s17 = sand.u32 1, %s1804_s13  }
  0xc8   : > { %s794_s16 = scalar_lea.sflag [#allocation7], %s793_s17 }
  0xc9   : > { %1250 = dma.done.wait (!%p1017_p1), %s794_s16, 32  }
  0xca   : > { %1252 = vsyncadd (!%p1017_p1), %s794_s16, 4294967264  ;;  %s22_s28 = sadd.s32 1, %s1295_s28   ;;  %s1805_s14 = sld [smem:[#allocation14_spill]] }
  0xcb   : > { %p19_p12 = scmp.ge.s32.totalorder %s22_s28, 10   ;;  %s1806_s23 = sld [smem:[#allocation19_spill]] }
  0xcc   : > { %s1807_s24 = sld [smem:[#allocation15_spill]]  ;;  %s1808_s25 = sld [smem:[#allocation16_spill]] }
  0xcd   : > { %s1809_s26 = sld [smem:[#allocation17_spill]]  ;;  %s1810_s27 = sld [smem:[#allocation18_spill]] }
  0xce   : > { %s1811_s18 = smov %s1259_s19  ;;  %s1812_s19 = smov %s1263_s20 }
  0xcf   : > { %s1813_s20 = smov %s1442_s30  ;;  %s1814_s21 = smov %s1271_s22 }
  0xd0   : > { %s1815_s22 = smov %s1805_s14  ;;  %21 = sbr.rel (!%p19_p12) target bundleno = 9 (0x9), region = 209 }
  0xd7   :  { %806 = vsyncpa [#allocation5], 1 }
  0xd8   :  { %808 = vsyncpa [#allocation5 + $0x1], 1 }
  0xd9   :  { %809 = vsyncpa [#allocation7], 1 }
  0xda   :  { %811 = vsyncpa [#allocation7 + $0x1], 1 }
  0xdb   :  { %812 = vsyncmov [#allocation3] }
  0xde   :  { %s813_s30 = vpop.sfrf %812 }
  0xdf   :  { %p1004_p7 = scmp.ne.s32.totalorder %s813_s30, 0 }
  0xe1   :  { %817 = shalt.err (%p1004_p7)  }
  0xe2   :  { %819 = vsyncmov [#allocation3 + $0x1] }
  0xe5   :  { %s820_s6 = vpop.sfrf %819 }
  0xe6   :  { %p1005_p13 = scmp.ne.s32.totalorder %s820_s6, 0 }
  0xe8   :  { %824 = shalt.err (%p1005_p13)  }

</bundles_post_ra>
